<compile_context>
chip_gen: v7x
topology: tpu7x:2x2x1
jax: 0.10.0
libtpu: 0.0.40
codegen_flags: <defaults>
</compile_context>

<pallas_src>
from math import log2, ceil
from functools import partial

import jax
import jax.numpy as jnp
from jax.experimental import pallas as pl
from jax.experimental.pallas import tpu as pltpu


def _vmem_limit_bytes():
    """Generation-aware VMEM scoped limit: ~3/4 of physical, capped at 100 MiB."""
    phys = 128 * 1024 * 1024
    try:
        get_info = getattr(pltpu, "get_tpu_info", None)
        if get_info is not None:
            cap = getattr(get_info(), "vmem_capacity_bytes", None)
            if cap:
                phys = int(cap)
    except Exception:
        pass
    return int(min(phys * 3 // 4, 100 * 1024 * 1024))


_VMEM_LIMIT = _vmem_limit_bytes()


def _compiler_params(semantics):
    return pltpu.CompilerParams(dimension_semantics=semantics,
                                vmem_limit_bytes=_VMEM_LIMIT)


def _pick_tile(n, cap, mult):
    """Largest t <= cap with n % t == 0 and t % mult == 0; falls back to the
    largest divisor <= cap (never returns an over-sized tile for n > cap)."""
    if n <= cap:
        return n
    for t in range(cap, 0, -1):
        if n % t == 0 and t % mult == 0:
            return t
    for t in range(cap, 0, -1):
        if n % t == 0:
            return t
    return n


# ------------- kernel 1: fused qkv projection, head-major fused output -------------

def _qkv_proj_kernel(x_ref, w_ref, o_ref):
    x = x_ref[...].astype(jnp.bfloat16)                          # (nt, dim)
    o_ref[...] = jnp.dot(x, w_ref[...],
                         preferred_element_type=jnp.float32).astype(o_ref.dtype)


def qkv_projection(x, w_qkv, *, heads, dim_head):
    """x: (B, N, dim); w_qkv: (dim, 3*H*D) laid out [q|k|v], each (h d).
    Returns fused head-major qkv: (B*H, N, 3*D) bf16 with lanes [q|k|v]."""
    B, N, dim = x.shape
    H, D = heads, dim_head
    HD = H * D
    # one-time host-side weight relayout: (dim, 3*H*D) -> (H, dim, 3*D) bf16
    wq = w_qkv[:, 0 * HD:1 * HD].reshape(dim, H, D)
    wk = w_qkv[:, 1 * HD:2 * HD].reshape(dim, H, D)
    wv = w_qkv[:, 2 * HD:3 * HD].reshape(dim, H, D)
    w = jnp.concatenate([wq, wk, wv], axis=-1)                   # (dim, H, 3D)
    w = jnp.transpose(w, (1, 0, 2)).astype(jnp.bfloat16)         # (H, dim, 3D)

    nt = _pick_tile(N, 512, 16)
    grid = (B, N // nt, H)                                       # h innermost -> x tile reused

    out = pl.pallas_call(
        _qkv_proj_kernel,
        out_shape=jax.ShapeDtypeStruct((B, H, N, 3 * D), jnp.bfloat16),
        grid=grid,
        in_specs=[
            pl.BlockSpec((None, nt, dim), lambda b, n, h: (b, n, 0)),
            pl.BlockSpec((None, dim, 3 * D), lambda b, n, h: (h, 0, 0)),
        ],
        out_specs=pl.BlockSpec((None, None, nt, 3 * D), lambda b, n, h: (b, h, n, 0)),
        compiler_params=_compiler_params(("parallel", "parallel", "arbitrary")),
    )(x, w)
    return out.reshape(B * H, N, 3 * D)


# ---------------- kernel 2: fused 2x coarsening of the fused qkv ----------------

def _coarsen_kernel(x_ref, o_ref, *, td, d):
    x = x_ref[...].astype(jnp.float32)                           # (bht, nt, 2*td)
    s = x[:, :, :td] + x[:, :, td:]                              # even + odd seq rows
    # q and k are means (x0.5), v is a sum (x1.0): single lane-constant multiply
    lane = jax.lax.broadcasted_iota(jnp.int32, (1, 1, td), 2)
    scale = jnp.where(lane < 2 * d, 0.5, 1.0).astype(jnp.float32)
    o_ref[...] = (s * scale).astype(o_ref.dtype)


def coarsen_qkv(qkv, *, dim_head):
    """qkv: (BH, N, 3D) bf16 -> (BH, N//2, 3D) bf16; q,k mean and v sum over pairs."""
    BH, N, TD = qkv.shape
    M = N // 2
    x2 = qkv.reshape(BH, M, 2 * TD)          # free view: row m = [seq 2m | seq 2m+1]

    bht = _pick_tile(BH, 8, 1)
    nt = _pick_tile(M, 512, 16)
    grid = (BH // bht, M // nt)

    return pl.pallas_call(
        partial(_coarsen_kernel, td=TD, d=dim_head),
        out_shape=jax.ShapeDtypeStruct((BH, M, TD), jnp.bfloat16),
        grid=grid,
        in_specs=[pl.BlockSpec((bht, nt, 2 * TD), lambda i, j: (i, j, 0))],
        out_specs=pl.BlockSpec((bht, nt, TD), lambda i, j: (i, j, 0)),
        compiler_params=_compiler_params(("parallel", "parallel")),
    )(x2)


# ---------------- kernel 3: per-level block-packed attention ----------------

def _hattn_kernel(x_ref, y_ref, a_ref, *, d, bsz, scale, flip):
    # fused qkv tile: lanes [0,d)=q, [d,2d)=k, [2d,3d)=v
    q = (x_ref[:, :, 0:d].astype(jnp.float32) * scale).astype(jnp.bfloat16)
    k = x_ref[:, :, d:2 * d]
    v = x_ref[:, :, 2 * d:3 * d]
    bht, rows, _ = q.shape

    # all blocks of this tile in ONE MXU matmul (instead of rows//bsz tiny ones)
    s = jnp.einsum('bid,bjd->bij', q, k, preferred_element_type=jnp.float32)

    # block mask: q block g attends k/v block g (or its pair g^1 when flipped);
    # flip_every_two therefore needs no data movement at all.
    rb = jax.lax.broadcasted_iota(jnp.int32, (rows, rows), 0) // bsz
    cb = jax.lax.broadcasted_iota(jnp.int32, (rows, rows), 1) // bsz
    tgt = rb ^ 1 if flip else rb
    s = jnp.where((cb == tgt)[None, :, :], s, -1e30)

    s = s - jnp.max(s, axis=-1, keepdims=True)                   # per-row (per-block) max
    a = jnp.exp(s)
    y = jnp.einsum('bij,bjd->bid', a.astype(jnp.bfloat16), v,
                   preferred_element_type=jnp.float32)

    y_ref[...] = y
    a_ref[...] = jnp.sum(a, axis=-1)                             # lane-dense (bht, rows)


def hattn_blocks(qkv, *, block_size, scale, flip, dim_head):
    """qkv: (BH, N, 3D) bf16 -> Y: (BH, N, D) f32, A: (BH, N) f32."""
    BH, N, TD = qkv.shape
    D = dim_head
    bsz = block_size

    # rows per grid step: multiple of 2*bsz so flip pairs stay inside one tile;
    # 128 rows fill a v5e MXU pass while bounding the masked-exp waste.
    R = N if N <= 128 else max(2 * bsz, 128)
    assert N % R == 0 and R % bsz == 0
    if flip:
        assert R % (2 * bsz) == 0

    if BH <= 8:
        bht = BH
    elif BH % 8 == 0:
        bht = 8
    else:
        bht = BH  # rare: sublane dim must be a multiple of 8 or the full extent

    grid = (BH // bht, N // R)
    Y, A = pl.pallas_call(
        partial(_hattn_kernel, d=D, bsz=bsz, scale=scale, flip=flip),
        out_shape=(jax.ShapeDtypeStruct((BH, N, D), jnp.float32),
                   jax.ShapeDtypeStruct((BH, N), jnp.float32)),
        grid=grid,
        in_specs=[pl.BlockSpec((bht, R, TD), lambda i, j: (i, j, 0))],
        out_specs=(pl.BlockSpec((bht, R, D), lambda i, j: (i, j, 0)),
                   pl.BlockSpec((bht, R), lambda i, j: (i, j))),
        compiler_params=_compiler_params(("parallel", "parallel")),
    )(qkv)
    return Y, A


# ---- kernel 4: fused level combine + normalize + head merge + output projection ----

def _combine_out_kernel(*refs, depths, heads, eps):
    L = len(depths)
    y_refs = refs[:L]
    a_refs = refs[L:2 * L]
    w_ref, b_ref, o_ref = refs[2 * L], refs[2 * L + 1], refs[2 * L + 2]
    H = heads
    nt = o_ref.shape[0]

    ysum = [None] * H
    asum = [None] * H
    for i, dep in enumerate(depths):
        y = y_refs[i][...]                                       # (H, nt_i, D) f32
        a = a_refs[i][...]                                       # (H, nt_i, 1) f32
        if dep:
            # coarse -> fine upsample (repeat each row 2**dep times) as a 0/1
            # selection matmul: rides the MXU, no vector relayouts.
            nti = y.shape[1]
            r_fine = jax.lax.broadcasted_iota(jnp.int32, (nt, nti), 0) >> dep
            c_coarse = jax.lax.broadcasted_iota(jnp.int32, (nt, nti), 1)
            U = (r_fine == c_coarse).astype(jnp.float32)         # (nt, nt_i)
        for h in range(H):
            yh = y[h]
            ah = a[h]
            if dep:
                yh = jnp.dot(U, yh, preferred_element_type=jnp.float32)
                ah = jnp.dot(U, ah, preferred_element_type=jnp.float32)
            ysum[h] = yh if ysum[h] is None else ysum[h] + yh
            asum[h] = ah if asum[h] is None else asum[h] + ah

    out = None
    for h in range(H):                                           # static unroll over heads
        inv = pl.reciprocal(asum[h] + eps, approx=True)          # (nt, 1), EUP
        yn = (ysum[h] * inv).astype(jnp.bfloat16)                # (nt, D)
        p = jnp.dot(yn, w_ref[h], preferred_element_type=jnp.float32)
        out = p if out is None else out + p
    o_ref[...] = (out + b_ref[...]).astype(o_ref.dtype)


def out_projection(Ys, As, depths, w_out, b_out, *, batch, heads, eps):
    """Fuses the coarse->fine repeat+add combine, Y/(A+eps), the head merge and the
    to_out Linear (with bias) into one kernel.  Ys[i]: (B*H, N>>depths[i], D)."""
    B, H = batch, heads
    BH, N, D = Ys[-1].shape
    dim = w_out.shape[1]
    max_depth = max(depths)
    unit = 8 << max_depth          # keeps every level's sub-tile >= 8 sublanes
    nt = N if N <= 1024 else max(unit, 1024)
    assert N % nt == 0
    # TODO(synk): extremely deep hierarchies (8 << max_depth >> 1024) would need a
    #             JAX-side fallback combine to bound the per-step VMEM footprint.

    y4 = [y.reshape(B, H, y.shape[1], D) for y in Ys]
    a4 = [a.reshape(B, H, a.shape[1], 1) for a in As]
    W = w_out.reshape(H, D, dim).astype(jnp.bfloat16)
    b2 = b_out.reshape(1, dim).astype(jnp.float32)

    in_specs = []
    for dep in depths:
        nti = nt >> dep
        in_specs.append(pl.BlockSpec((None, H, nti, D), lambda bb, nn: (bb, 0, nn, 0)))
    for dep in depths:
        nti = nt >> dep
        in_specs.append(pl.BlockSpec((None, H, nti, 1), lambda bb, nn: (bb, 0, nn, 0)))
    in_specs.append(pl.BlockSpec((H, D, dim), lambda bb, nn: (0, 0, 0)))
    in_specs.append(pl.BlockSpec((1, dim), lambda bb, nn: (0, 0)))

    grid = (B, N // nt)
    return pl.pallas_call(
        partial(_combine_out_kernel, depths=tuple(depths), heads=H, eps=eps),
        out_shape=jax.ShapeDtypeStruct((B, N, dim), jnp.float32),
        grid=grid,
        in_specs=in_specs,
        out_specs=pl.BlockSpec((None, nt, dim), lambda bb, nn: (bb, nn, 0)),
        compiler_params=_compiler_params(("parallel", "parallel")),
    )(*y4, *a4, W, b2)


# ------------------------------ forward glue ------------------------------- #

def hattention1d_forward(x, params, *, heads, dim_head, block_size, eps=1e-8):
    b, n, dim = x.shape
    scale = dim_head ** (-0.5)
    bsz = block_size

    pad_to_len = 2 ** ceil(log2(n))
    padding = pad_to_len - n
    if padding != 0:
        x = jnp.pad(x, ((0, 0), (0, padding), (0, 0)))

    # fused qkv projection -> head-major fused (B*H, N, 3D) bf16
    qkv = qkv_projection(x, params['w_qkv'], heads=heads, dim_head=dim_head)

    num_levels = int(log2(pad_to_len // bsz)) - 2
    assert num_levels >= 0, 'number of levels must be at least greater than 0'

    levels = [qkv]
    cur = qkv
    for _ in range(num_levels):
        cur = coarsen_qkv(cur, dim_head=dim_head)                # fused mean/mean/sum
        levels.append(cur)
    levels = [levels[0], *levels]

    Ys, As, depths = [], [], []
    for ind, qkv_l in enumerate(reversed(levels)):
        is_last = ind == len(levels) - 1
        Y_l, A_l = hattn_blocks(qkv_l, block_size=bsz, scale=scale,
                                flip=not is_last, dim_head=dim_head)
        Ys.append(Y_l)
        As.append(A_l)
        depths.append(int(log2(pad_to_len // qkv_l.shape[1])))

    # fused level combine + normalization + head merge + to_out projection (w/ bias)
    out = out_projection(Ys, As, depths, params['w_out'], params['b_out'],
                         batch=b, heads=heads, eps=eps)
    return out[:, :n]


# ---------------------------------- main ----------------------------------- #

if __name__ == "__main__":
    # small, module-consistent shapes
    batch = 2
    seq = 64          # pad_to_len = 64, num_levels = log2(64/8) - 2 = 1
    dim = 32
    heads = 2
    dim_head = 32
    block_size = 8
    inner_dim = heads * dim_head

    key = jax.random.PRNGKey(0)
    kx, kqkv, kwo, kbo = jax.random.split(key, 4)

    x = jax.random.normal(kx, (batch, seq, dim), dtype=jnp.float32)

    params = {
        'w_qkv': 0.02 * jax.random.normal(kqkv, (dim, inner_dim * 3), dtype=jnp.float32),
        'w_out': 0.02 * jax.random.normal(kwo, (inner_dim, dim), dtype=jnp.float32),
        'b_out': 0.02 * jax.random.normal(kbo, (dim,), dtype=jnp.float32),
    }

    out = hattention1d_forward(
        x, params, heads=heads, dim_head=dim_head, block_size=block_size, eps=1e-8
    )
    out = jax.block_until_ready(out)
    assert out.shape == (batch, seq, dim), out.shape
    assert bool(jnp.all(jnp.isfinite(out)))
    print("KERNEL_OK")
</pallas_src>

<mosaic_0001>
module attributes {stable_mosaic.version = 11 : i64} {
  func.func @_qkv_proj_kernel(%arg0: i32, %arg1: i32, %arg2: i32, %arg3: memref<1x64x32xf32, #tpu.memory_space<vmem>>, %arg4: memref<1x32x96xbf16, #tpu.memory_space<vmem>>, %arg5: memref<1x1x64x96xbf16, #tpu.memory_space<vmem>>) attributes {dimension_semantics = [#tpu.dimension_semantics<parallel>, #tpu.dimension_semantics<parallel>, #tpu.dimension_semantics<arbitrary>], iteration_bounds = array<i64: 2, 1, 2>, scalar_prefetch = 0 : i64, scratch_operands = 0 : i64, tpu.core_type = #tpu.core_type<tc>, window_params = [{transform_indices = @transform_0, window_bounds = array<i64: 1, 64, 32>}, {transform_indices = @transform_1, window_bounds = array<i64: 1, 32, 96>}, {transform_indices = @transform_2, window_bounds = array<i64: 1, 1, 64, 96>}]} {
    %c0 = arith.constant 0 : index
    %c0_0 = arith.constant 0 : index
    %c0_1 = arith.constant 0 : index
    %0 = vector.load %arg3[%c0, %c0_0, %c0_1] : memref<1x64x32xf32, #tpu.memory_space<vmem>>, vector<1x64x32xf32>
    %1 = vector.shape_cast %0 : vector<1x64x32xf32> to vector<64x32xf32>
    %2 = arith.truncf %1 : vector<64x32xf32> to vector<64x32xbf16>
    %c0_2 = arith.constant 0 : index
    %c0_3 = arith.constant 0 : index
    %c0_4 = arith.constant 0 : index
    %3 = vector.load %arg4[%c0_2, %c0_3, %c0_4] : memref<1x32x96xbf16, #tpu.memory_space<vmem>>, vector<1x32x96xbf16>
    %4 = vector.shape_cast %3 : vector<1x32x96xbf16> to vector<32x96xbf16>
    %cst = arith.constant dense<0.000000e+00> : vector<64x96xf32>
    %5 = tpu.matmul %2, %4, %cst {dimension_numbers = #tpu.dot_dimension_numbers<[1], [0], [0], [1], [0, 0, 1, 1], [], []>} : vector<64x32xbf16>, vector<32x96xbf16>, vector<64x96xf32> -> vector<64x96xf32>
    %6 = arith.truncf %5 : vector<64x96xf32> to vector<64x96xbf16>
    %c0_5 = arith.constant 0 : index
    %c0_6 = arith.constant 0 : index
    %c0_7 = arith.constant 0 : index
    %c0_8 = arith.constant 0 : index
    %7 = vector.load %arg5[%c0_5, %c0_6, %c0_7, %c0_8] : memref<1x1x64x96xbf16, #tpu.memory_space<vmem>>, vector<1x1x64x96xbf16>
    %8 = vector.shape_cast %7 : vector<1x1x64x96xbf16> to vector<64x96xbf16>
    %9 = vector.shape_cast %6 : vector<64x96xbf16> to vector<1x1x64x96xbf16>
    tpu.vector_store %arg5[%c0_5, %c0_6, %c0_7, %c0_8], %9 {strides = array<i32>} : memref<1x1x64x96xbf16, #tpu.memory_space<vmem>>, vector<1x1x64x96xbf16>,
    return
  }
  func.func @transform_0(%arg0: i32, %arg1: i32, %arg2: i32) -> (i32, i32, i32) {
    %c0_i32 = arith.constant 0 : i32
    %c0_i32_0 = arith.constant 0 : i32
    return %arg0, %arg1, %c0_i32 : i32, i32, i32
  }
  func.func @transform_1(%arg0: i32, %arg1: i32, %arg2: i32) -> (i32, i32, i32) {
    %c0_i32 = arith.constant 0 : i32
    %c0_i32_0 = arith.constant 0 : i32
    %c0_i32_1 = arith.constant 0 : i32
    return %arg2, %c0_i32, %c0_i32_0 : i32, i32, i32
  }
  func.func @transform_2(%arg0: i32, %arg1: i32, %arg2: i32) -> (i32, i32, i32, i32) {
    %c0_i32 = arith.constant 0 : i32
    %c0_i32_0 = arith.constant 0 : i32
    return %arg0, %arg2, %arg1, %c0_i32 : i32, i32, i32, i32
  }
}

</mosaic_0001>

<bundles_post_ra>
// kernel: tpu_custom_call.1
= control target key start
LH: loop header
LB: loop body
LE: loop exit
PB: predicated region body
PF: predicated region fallthrough
CT: control target
= control target key end

     0   :  { %s1312_s0 = inlined_call_operand.hbm [shape: f32[2,64,32], index: 0, kind: input, shape index: {}]   ;;  %s1313_s1 = inlined_call_operand.hbm [shape: bf16[2,32,96], index: 1, kind: input, shape index: {}]   ;;  %s1314_s2 = inlined_call_operand.hbm [shape: bf16[2,2,64,96], index: 2, kind: output, shape index: {}]  }
   0x1   :  { %1326 = sst [smem:[#allocation17_spill]] %s1312_s0 }
   0x2   :  { %1327 = sst [smem:[#allocation18_spill]] %s1314_s2 }
   0x3   :  { %7 = vsyncpa [#allocation3], 0 }
   0x4   :  { %9 = vsyncpa [#allocation3 + $0x1], 0 }
   0x5   :  { %10 = vsyncpa [#allocation6], 0 }
   0x6   :  { %12 = vsyncpa [#allocation6 + $0x1], 0 }
   0x7   :  { %13 = vsyncpa [#allocation4], 0 }
   0x8   :  { %15 = vsyncpa [#allocation4 + $0x1], 0  ;;  %s956_s9 = smov 0   ;;  %s958_s10 = smov 0  }
   0x9   :  { %s960_s11 = smov 0   ;;  %s962_s12 = smov 0  }
   0xa   :  { %s964_s13 = smov 0   ;;  %s966_s14 = smov 0  }
   0xb   :  { %s968_s15 = smov 0   ;;  %s970_s16 = smov 0  }
   0xc   :  { %s972_s17 = smov 0   ;;  %s974_s18 = smov 0  }
   0xd   :  { %s976_s19 = smov 0   ;;  %s978_s20 = smov 0  }
   0xe   :  { %s980_s21 = smov 0   ;;  %s982_s22 = smov 0  }
   0xf LB: > { %1328 = sst [smem:[#allocation11_spill]] %s918_s19  ;;  %s515_s23 = sadd.s32 4294967295, %s930_s22   ;;  %s930_s22 = sphi %s982_s22, %s21_s22   ;;  %s926_s21 = sphi %s980_s21, %s1360_s21   ;;  %s922_s20 = sphi %s978_s20, %s1372_s20   ;;  %s918_s19 = sphi %s976_s19, %s1371_s19   ;;  %s914_s18 = sphi %s974_s18, %s1370_s18   ;;  %s910_s17 = sphi %s972_s17, %s1369_s17   ;;  %s906_s16 = sphi %s970_s16, %s1368_s16   ;;  %s902_s15 = sphi %s968_s15, %s1367_s15   ;;  %s898_s14 = sphi %s966_s14, %s1366_s14   ;;  %s894_s13 = sphi %s964_s13, %s1365_s13   ;;  %s890_s12 = sphi %s962_s12, %s1364_s12   ;;  %s886_s11 = sphi %s960_s11, %s1363_s11   ;;  %s882_s10 = sphi %s958_s10, %s1362_s10   ;;  %s878_s9 = sphi %s956_s9, %s1361_s9  }
  0x10   : > { %1329 = sst [smem:[#allocation12_spill]] %s926_s21  ;;  %s40_s24 = sadd.s32 1, %s926_s21 }
  0x11   : > { %p56_p0 = scmp.ne.s32.totalorder %s910_s17, %s906_s16  ;;  %p1316_p1 = scmp.eq.s32.totalorder %s930_s22, 0 }
  0x12   : > { %p62_p2 = scmp.ne.s32.totalorder %s906_s16, %s902_s15  ;;  %p1031_p3 = scmp.eq.s32.totalorder %s515_s23, 0 }
  0x13   : > { %p1035_p4 = scmp.eq.s32.totalorder %s515_s23, 3  ;;  %p58_p5 = por %p1316_p1, %p56_p0 }
  0x14   : > { %p1043_p6 = por %p1031_p3, %p62_p2  ;;  %p1315_p7 = scmp.lt.s32.totalorder %s930_s22, 4 }
  0x15   : > { %s1331_s27 = scalar_select %p1035_p4, 1, 0 }
  0x16   : > { %s1332_s28 = scalar_select %p1043_p6, 1, 0 }
  0x17   : > { %s142_s29 = sand.u32 1, %s910_s17   ;;  %s549_s30 = sshll.u32 %s926_s21, 10 }
  0x18   : > { %s519_s3 = sshll.u32 %s142_s29, 6  ;;  %s1333_s0 = sld [smem:[#allocation17_spill]] }
  0x19   : > { %s146_s7 = scalar_lea.vmem [#allocation2], %s519_s3  ;;  %p1057_p8 = pnand %p1315_p7, %p58_p5 }
  0x1a   : > { %s155_s8 = sshll.u32 %s146_s7, 4  ;;  %s1063_s23 = scalar_lea.sflag [#allocation3], %s142_s29  ;;  %s1061_s8 = int_to_ptr.vmem [resolvable:$true] %s155_s8 }
  0x1b   : > { %p722_p10 = pneg %p1057_p8 }
  0x1e   : > { %s1053_s6 = scalar_lea.hbm %s1333_s0, %s549_s30  ;;  %s725_s5 = scalar_lea.hbm %s1333_s0, 2048 }
  0x1f   : > { %s720_s4 = scalar_lea.hbm %s1053_s6, 1024  ;;  %p726_p13 = scmp.lt.u32.totalorder %s1053_s6, %s1333_s0 }
  0x20   : > { %p721_p9 = scmp.ne.s32.totalorder %s1053_s6, %s720_s4  ;;  %p727_p0 = scmp.lt.u32.totalorder %s725_s5, %s720_s4 }
  0x21   : > { %p729_p5 = scmp.lt.u32.totalorder %s720_s4, %s1053_s6 }
  0x22   : > { %p723_p11 = pnand %p722_p10, %p721_p9  ;;  %p728_p2 = por %p727_p0, %p726_p13 }
  0x24   : > { %p724_p12 = pneg %p723_p11  ;;  %p730_p7 = por %p729_p5, %p728_p2 }
  0x26   : > { %p731_p1 = pnand %p730_p7, %p724_p12 }
  0x28   : > { %734 = shalt.err (!%p731_p1)
}
  0x29   : > { %s735_s29 = scalar_lea.vmem %s1061_s8, 1024  ;;  %s932_s30 = smov [#allocation2]  }
  0x2a   : > { %p736_p9 = scmp.ne.s32.totalorder %s1061_s8, %s735_s29  ;;  %s740_s3 = sshll.u32 %s932_s30, 4  ;;  %s741_s3 = int_to_ptr.vmem [resolvable:$false] %s740_s3 }
  0x2b   : > { %s742_s25 = scalar_lea.vmem %s741_s3, 2048  ;;  %p743_p4 = scmp.lt.s32.totalorder %s1061_s8, %s741_s3 }
  0x2c   : > { %p738_p11 = pnand %p736_p9, %p722_p10  ;;  %p744_p13 = scmp.lt.s32.totalorder %s742_s25, %s735_s29 }
  0x2e   : > { %p739_p6 = pneg %p738_p11  ;;  %p745_p0 = por %p744_p13, %p743_p4 }
  0x30   : > { %p746_p2 = pnand %p745_p0, %p739_p6 }
  0x32   : > { %749 = shalt.err (!%p746_p2)
}
  0x33   : > { %s933_s4 = smov 128   ;;  %s934_s5 = smov 8  }
  0x34   : > { %590 = dma.hbm_to_vmem [thread:$0]  (!%p1057_p8), %s1053_s6, 1024, %s1061_s8, %s1063_s23, %s933_s4, %s933_s4, %s934_s5  }
  0x35   : > { %p525_p1 = scmp.ge.s32.totalorder %s930_s22, 1  ;;  %p184_p4 = scmp.lt.s32.totalorder %s930_s22, 5 }
  0x36   : > { %s516_s29 = sadd.s32 4294967294, %s930_s22   ;;  %s33_s30 = sadd.s32 1, %s922_s20 }
  0x37   : > { %p1093_p6 = pnand %p525_p1, %p184_p4  ;;  %s75_s3 = sadd.s32 1, %s898_s14 }
  0x38   : > { %p34_p7 = scmp.ge.s32.totalorder %s33_s30, 2  ;;  %p82_p10 = scmp.ne.s32.totalorder %s898_s14, %s894_s13 }
  0x39   : > { %p88_p12 = scmp.ne.s32.totalorder %s894_s13, %s890_s12  ;;  %s105_s15 = sadd.s32 1, %s886_s11 }
  0x3a   : > { %s1374_s30 = smov (%p34_p7, %s33_s30), 0  ;;  %s1376_s24 = smov (!%p34_p7, %s40_s24), %s926_s21 }
  0x3b   : > { %1336 = sst [smem:[#allocation13_spill]] %s1374_s30  ;;  %s72_s6 = ssub.s32 %s922_s20, %s1374_s30 }
  0x3c   : > { %p1337_p8 = scmp.eq.s32.totalorder %s930_s22, 0  ;;  %p42_p9 = scmp.ge.s32.totalorder %s1376_s24, 2 }
  0x3d   : > { %p73_p11 = scmp.eq.s32.totalorder %s72_s6, 0  ;;  %p1120_p13 = por %p88_p12, %p1031_p3 }
  0x3e   : > { %p1114_p5 = por %p82_p10, %p1337_p8  ;;  %p115_p0 = scmp.ne.s32.totalorder %s886_s11, %s882_s10 }
  0x3f   : > { %s1339_s12 = scalar_select %p1120_p13, 1, 0 }
  0x40   : > { %s1378_s24 = smov (%p42_p9, %s1376_s24), 0  ;;  %p1342_p2 = scmp.ne.s32.totalorder %s1331_s27, 0 }
  0x41   : > { %1340 = sst [smem:[#allocation14_spill]] %s1378_s24  ;;  %s44_s25 = ssub.s32 %s926_s21, %s1378_s24 }
  0x42   : > { %s1129_s23 = scalar_select %p73_p11, %s898_s14, %s75_s3  }
  0x43   : > { %p1135_p1 = por %p1342_p2, %p115_p0  ;;  %p47_p4 = scmp.eq.s32.totalorder %s44_s25, 0 }
  0x44   : > { %1341 = sst [smem:[#allocation15_spill]] %s1129_s23  ;;  %s100_s26 = sor.u32 %s72_s6, %s44_s25 }
  0x45   : > { %s1343_s4 = scalar_select %p1135_p1, 1, 0 }
  0x46   : > { %p103_p3 = scmp.eq.s32.totalorder %s100_s26, 0  ;;  %p121_p7 = scmp.ne.s32.totalorder %s882_s10, %s878_s9 }
  0x47   : > { %1344 = sst [smem:[#allocation16_spill]] %s1343_s4  ;;  %s1345_s5 = sadd.s32 1, %s910_s17 }
  0x48   : > { %s1144_s0 = scalar_select %p47_p4, %s910_s17, %s1345_s5  }
  0x49   : > { %s1147_s30 = scalar_select %p103_p3, %s886_s11, %s105_s15  }
  0x4a   : > { %p122_p10 = scmp.eq.s32.totalorder %s516_s29, 3  ;;  %s165_s3 = sand.u32 1, %s898_s14  }
  0x4b   : > { %s522_s23 = sshll.u32 %s165_s3, 4  ;;  %s550_s24 = sshll.u32 %s922_s20, 8 }
  0x4c   : > { %p1150_p12 = por %p122_p10, %p121_p7  ;;  %s169_s21 = scalar_lea.vmem [#allocation5], %s522_s23 }
  0x4d   : > { %s176_s2 = sshll.u32 %s169_s21, 4  ;;  %s1158_s6 = scalar_lea.hbm %s1313_s1, %s550_s24  ;;  %s1160_s2 = int_to_ptr.vmem [resolvable:$true] %s176_s2 }
  0x4e   : > { %s1346_s27 = scalar_select %p1150_p12, 1, 0 }
  0x4f   : > { %p1347_p8 = scmp.lt.s32.totalorder %s930_s22, 4  ;;  %s1170_s21 = scalar_lea.sflag [#allocation6], %s165_s3 }
  0x50   : > { %s750_s15 = scalar_lea.hbm %s1158_s6, 256  ;;  %s755_s8 = scalar_lea.hbm %s1313_s1, 512 }
  0x51   : > { %p1166_p9 = pnand %p1347_p8, %p1114_p5  ;;  %p751_p11 = scmp.ne.s32.totalorder %s1158_s6, %s750_s15 }
  0x52   : > { %p756_p5 = scmp.lt.u32.totalorder %s1158_s6, %s1313_s1  ;;  %p757_p3 = scmp.lt.u32.totalorder %s755_s8, %s750_s15 }
  0x53   : > { %p752_p0 = pneg %p1166_p9  ;;  %p759_p10 = scmp.lt.u32.totalorder %s750_s15, %s1158_s6 }
  0x54   : > { %p758_p7 = por %p757_p3, %p756_p5 }
  0x55   : > { %p753_p2 = pnand %p752_p0, %p751_p11 }
  0x56   : > { %p760_p8 = por %p759_p10, %p758_p7 }
  0x57   : > { %p754_p4 = pneg %p753_p2 }
  0x59   : > { %p761_p12 = pnand %p760_p8, %p754_p4 }
  0x5b   : > { %764 = shalt.err (!%p761_p12)
}
  0x5c   : > { %s765_s4 = scalar_lea.vmem %s1160_s2, 256  ;;  %s935_s26 = smov [#allocation5]  }
  0x5d   : > { %p766_p11 = scmp.ne.s32.totalorder %s1160_s2, %s765_s4  ;;  %s770_s5 = sshll.u32 %s935_s26, 4  ;;  %s771_s5 = int_to_ptr.vmem [resolvable:$false] %s770_s5 }
  0x5e   : > { %s772_s3 = scalar_lea.vmem %s771_s5, 512  ;;  %p773_p13 = scmp.lt.s32.totalorder %s1160_s2, %s771_s5 }
  0x5f   : > { %p768_p2 = pnand %p766_p11, %p752_p0  ;;  %p774_p5 = scmp.lt.s32.totalorder %s772_s3, %s765_s4 }
  0x61   : > { %p769_p1 = pneg %p768_p2  ;;  %p775_p3 = por %p774_p5, %p773_p13 }
  0x63   : > { %p776_p7 = pnand %p775_p3, %p769_p1 }
  0x65   : > { %779 = shalt.err (!%p776_p7)
}
  0x66   : > { %s936_s15 = smov 64   ;;  %s937_s19 = smov 4  }
  0x67   : > { %593 = dma.hbm_to_vmem [thread:$0]  (!%p1166_p9), %s1158_s6, 256, %s1160_s2, %s1170_s21, %s936_s15, %s936_s15, %s937_s19  }
  0x68   : > { %188 = sbr.rel (%p1093_p6) target bundleno = 357 (0x165), region = 28  ;;  %s190_s24 = sand.u32 (!%p1093_p6), 1, %s906_s16  }
  0x69   : > { %s526_s8 = sshll.u32 (!%p1093_p6), %s190_s24, 6  ;;  %s191_s23 = scalar_lea.sflag (!%p1093_p6), [#allocation3], %s190_s24 }
  0x6a   : > { %s194_s25 = scalar_lea.vmem (!%p1093_p6), [#allocation2], %s526_s8  ;;  %p1349_p13 = scmp.ne.s32.totalorder (!%p1093_p6), %s1332_s28, 0 }
  0x6f   : > { %865 = dma.done.wait (%p1349_p13), %s191_s23, 1024  }
  0x70   : > { %867 = vsyncadd (%p1349_p13), %s191_s23, 4294966272  ;;  %s199_s4 = sand.u32 1, %s894_s13   ;;  %p1350_p1 = scmp.ne.s32.totalorder %s1339_s12, 0 }
  0x71   : > { %s527_s26 = sshll.u32 %s199_s4, 4  ;;  %s200_s29 = scalar_lea.sflag [#allocation6], %s199_s4 }
  0x72   : > { %s203_s2 = scalar_lea.vmem [#allocation5], %s527_s26 }
  0x73   : > { %869 = dma.done.wait (%p1350_p1), %s200_s29, 256  }
  0x74   : > { %871 = vsyncadd (%p1350_p1), %s200_s29, 4294967040  ;;  %v718_v0 = vld [vmem:[%s203_s2] sm:$0xff]   ;;  %v719_v1 = vld [vmem:[%s203_s2 + $0x8] sm:$0xff]   ;;  %vm260_vm0 = vcmask 261120   ;;  %s1351_s28 = sld [smem:[#allocation11_spill]]  ;;  %s226_s7 = sand.u32 1, %s882_s10  }
  0x75   : > { %565 = vmatprep.subr.bf16.mxu0 %v718_v0  ;;  %577 = vmatprep.subr.bf16.mxu1 %v718_v0  ;;  %v232_v2 = vld [vmem:[%s194_s25] sm:$0xff]  ;;  %v233_v3 = vld [vmem:[%s194_s25 + $0x8] sm:$0xff]  ;;  %v234_v7 = vld [vmem:[%s194_s25 + $0x10] sm:$0xff]  ;;  %s544_s12 = sshll.u32 %s914_s18, 3  ;;  %s528_s21 = sshll.u32 %s226_s7, 5  ;;  %vm370_vm1 = vcmask 781312  }
  0x76   : > { %v236_v4 = vld [vmem:[%s194_s25 + $0x20] sm:$0xff]  ;;  %566 = vmatpush3.bf16.msra.mxu0 %v718_v0  ;;  %579 = vmatpush3.bf16.msra.mxu1 %v718_v0  ;;  %v240_v5 = vpack.c.bf16 %v233_v3, %v232_v2  ;;  %v237_v6 = vld [vmem:[%s194_s25 + $0x28] sm:$0xff]  ;;  %v235_v8 = vld [vmem:[%s194_s25 + $0x18] sm:$0xff]  ;;  %s228_s15 = scalar_lea.vmem [#allocation7], %s528_s21  ;;  %s1352_s18 = sld [smem:[#allocation16_spill]] }
  0x77   : > { %567 = vmatprep.subr.bf16.mxu0 %v719_v1  ;;  %578 = vmatprep.subr.bf16.mxu1 %v719_v1  ;;  %v242_v9 = vpack.c.bf16 %v237_v6, %v236_v4  ;;  %v238_v10 = vld [vmem:[%s194_s25 + $0x30] sm:$0xff]  ;;  %v239_v11 = vld [vmem:[%s194_s25 + $0x38] sm:$0xff]  ;;  %v241_v12 = vpack.c.bf16 %v235_v8, %v234_v7  ;;  %s397_s19 = sshll.u32 %s228_s15, 4  ;;  %s1353_s23 = sld [smem:[#allocation18_spill]]  ;;  %s1226_s19 = int_to_ptr.vmem [resolvable:$true] %s397_s19 }
  0x78   : > { %569 = vmatprep.mubr.msk.bf16.mxu0 %vm260_vm0, %v240_v5  ;;  %v243_v13 = vpack.c.bf16 %v239_v11, %v238_v10  ;;  %s1236_s4 = scalar_lea.sflag [#allocation4], %s226_s7  ;;  %s780_s26 = scalar_lea.vmem %s1226_s19, 512 }
  0x79   : > { %573 = vmatprep.mubr.msk.bf16.mxu1 %vm260_vm0, %v242_v9  ;;  %p781_p6 = scmp.ne.s32.totalorder %s1226_s19, %s780_s26  ;;  %s938_s29 = smov [#allocation7]  }
  0x7a   : > { %568 = vmatpush3.bf16.msra.mxu0 %v719_v1  ;;  %580 = vmatpush3.bf16.msra.mxu1 %v719_v1  ;;  %s545_s6 = sshll.u32 %s1351_s28, 4  ;;  %s784_s2 = sshll.u32 %s938_s29, 4  ;;  %s785_s2 = int_to_ptr.vmem [resolvable:$false] %s784_s2 }
  0x7b   : > { %s394_s5 = sadd.s32 %s545_s6, %s544_s12  ;;  %s786_s28 = scalar_lea.vmem %s785_s2, 1024 }
  0x7c   : > { %s546_s3 = sshll.u32 %s394_s5, 6  ;;  %p1354_p12 = scmp.ne.s32.totalorder %s1352_s18, 0 }
  0x7d   : > { %570 = vmatmul.mubr.msk.bf16.vlgmr.msra.gmra.mrb[0].mxu0 %vm260_vm0, %v241_v12  ;;  %574 = vmatmul.mubr.msk.bf16.vlgmr.msra.gmra.mrb[0].mxu1 %vm260_vm0, %v243_v13  ;;  %s1224_s25 = scalar_lea.hbm %s1353_s23, %s546_s3  ;;  %p787_p4 = scmp.lt.s32.totalorder %s1226_s19, %s785_s2 }
  0x7e   : > { %p782_p9 = pnand %p781_p6, %p1354_p12  ;;  %p788_p10 = scmp.lt.s32.totalorder %s786_s28, %s780_s26 }
  0x80   : > { %p783_p0 = pneg %p782_p9  ;;  %p789_p8 = por %p788_p10, %p787_p4 }
  0x82   : > { %p790_p11 = pnand %p789_p8, %p783_p0 }
 0x150   : > { %v571_v14 = vpop.f32.mrb[0].mxu0  ;;  %v575_v15 = vpop.f32.mrb[0].mxu1 }
 0x151   : > { %v553_v16 = vpack.c.bf16 %v571_v14, %v571_v14  ;;  %v557_v17 = vpack.c.bf16 %v575_v15, %v575_v15  ;;  %v307_v18 = vpop.f32.mrb[1].mxu0  ;;  %v323_v19 = vpop.f32.mrb[1].mxu1 }
 0x152   : > { %v551_v20 = vpack.c.bf16 %v307_v18, %v307_v18  ;;  %v555_v21 = vpack.c.bf16 %v323_v19, %v323_v19  ;;  %v572_v22 = vpop.f32.mrb[2].mxu0  ;;  %v576_v23 = vpop.f32.mrb[2].mxu1 }
 0x153   : > { %373 = vst.msk [vmem:[%s228_s15 + $0x8] sm:$0xf] %vm370_vm1, %v553_v16  ;;  %377 = vst.msk [vmem:[%s228_s15 + $0x18] sm:$0xf] %vm370_vm1, %v557_v17  ;;  %v554_v24 = vpack.c.bf16 %v572_v22, %v572_v22  ;;  %v558_v25 = vpack.c.bf16 %v576_v23, %v576_v23  ;;  %v310_v26 = vpop.f32.mrb[3].mxu0  ;;  %v326_v27 = vpop.f32.mrb[3].mxu1 }
 0x154   : > { %371 = vst.msk [vmem:[%s228_s15] sm:$0xf] %vm370_vm1, %v551_v20  ;;  %375 = vst.msk [vmem:[%s228_s15 + $0x10] sm:$0xf] %vm370_vm1, %v555_v21  ;;  %v552_v28 = vpack.c.bf16 %v310_v26, %v310_v26  ;;  %v556_v29 = vpack.c.bf16 %v326_v27, %v326_v27 }
 0x155   : > { %374 = vst.msk [vmem:[%s228_s15 + $0xc] sm:$0xf] %vm370_vm1, %v554_v24  ;;  %378 = vst.msk [vmem:[%s228_s15 + $0x1c] sm:$0xf] %vm370_vm1, %v558_v25 }
 0x156   : > { %372 = vst.msk [vmem:[%s228_s15 + $0x4] sm:$0xf] %vm370_vm1, %v552_v28  ;;  %376 = vst.msk [vmem:[%s228_s15 + $0x14] sm:$0xf] %vm370_vm1, %v556_v29 }
 0x157   : > { %793 = shalt.err (!%p790_p11)
}
 0x158   : > { %s794_s7 = scalar_lea.hbm %s1224_s25, 512  ;;  %s798_s21 = scalar_lea.hbm %s1353_s23, 2048 }
 0x159   : > { %p795_p2 = scmp.ne.s32.totalorder %s1224_s25, %s794_s7  ;;  %p799_p7 = scmp.lt.u32.totalorder %s1224_s25, %s1353_s23 }
 0x15a   : > { %p800_p13 = scmp.lt.u32.totalorder %s798_s21, %s794_s7  ;;  %p802_p6 = scmp.lt.u32.totalorder %s794_s7, %s1224_s25 }
 0x15b   : > { %p796_p5 = pnand %p795_p2, %p1354_p12 }
 0x15c   : > { %p801_p1 = por %p800_p13, %p799_p7 }
 0x15d   : > { %p797_p3 = pneg %p796_p5 }
 0x15e   : > { %p803_p9 = por %p802_p6, %p801_p1 }
 0x160   : > { %p804_p0 = pnand %p803_p9, %p797_p3 }
 0x162   : > { %807 = shalt.err (!%p804_p0)
}
 0x163   : > { %s939_s15 = smov 64   ;;  %s940_s24 = smov 4  }
 0x164   : > { %585 = dma.vmem_to_hbm [thread:$0]  (%p1354_p12), %s1226_s19, 512, %s1224_s25, %s1236_s4, %s939_s15, %s939_s15, %s940_s24  }
 0x165 PF: > { %p599_p4 = scmp.ge.s32.totalorder %s930_s22, 2  ;;  %s412_s8 = sand.u32 1, %s878_s9  }
 0x166   : > { %p1355_p10 = scmp.ne.s32.totalorder %s1346_s27, 0  ;;  %s413_s26 = scalar_lea.sflag [#allocation4], %s412_s8 }
 0x168   : > { %p595_p8 = pnand %p599_p4, %p1355_p10 }
 0x16a   : > { %873 = dma.done.wait (!%p595_p8), %s413_s26, 512  }
 0x16b   : > { %875 = vsyncadd (!%p595_p8), %s413_s26, 4294966784  ;;  %s21_s22 = sadd.s32 1, %s930_s22   ;;  %s1357_s19 = sld [smem:[#allocation15_spill]] }
 0x16c   : > { %p1265_p11 = scmp.ge.s32.totalorder %s21_s22, 6   ;;  %s1358_s27 = sld [smem:[#allocation12_spill]] }
 0x16d   : > { %s1359_s25 = sld [smem:[#allocation13_spill]]  ;;  %s1360_s21 = sld [smem:[#allocation14_spill]] }
 0x16e   : > { %s1361_s9 = smov %s882_s10  ;;  %s1362_s10 = smov %s886_s11 }
 0x16f   : > { %s1363_s11 = smov %s1147_s30  ;;  %s1364_s12 = smov %s894_s13 }
 0x170   : > { %s1365_s13 = smov %s898_s14  ;;  %s1367_s15 = smov %s906_s16 }
 0x171   : > { %s1366_s14 = smov %s1357_s19  ;;  %s1368_s16 = smov %s910_s17 }
 0x172   : > { %s1369_s17 = smov %s1144_s0  ;;  %s1370_s18 = smov %s922_s20 }
 0x173   : > { %s1371_s19 = smov %s1358_s27  ;;  %s1372_s20 = smov %s1359_s25 }
 0x174   :  { %20 = sbr.rel (!%p1265_p11) target bundleno = 15 (0xf), region = 86 }
 0x17b   :  { %418 = vsyncpa [#allocation3], 1 }
 0x17c   :  { %420 = vsyncpa [#allocation3 + $0x1], 1 }
 0x17d   :  { %421 = vsyncpa [#allocation6], 1 }
 0x17e   :  { %423 = vsyncpa [#allocation6 + $0x1], 1 }
 0x17f   :  { %424 = vsyncpa [#allocation4], 1 }
 0x180   :  { %426 = vsyncpa [#allocation4 + $0x1], 1 }

</bundles_post_ra>
